<compile_context>
chip_gen: v6e
topology: v6e:2x2x1
jax: 0.10.0
libtpu: 0.0.40
codegen_flags: <defaults>
</compile_context>

<pallas_src>
import functools

import jax
import jax.numpy as jnp
from jax import lax
from jax.experimental import pallas as pl
from jax.experimental.pallas import tpu as pltpu


# ----------------------------------------------------------------------------
# Kernel: instance-norm (eps=1e-3, biased var) folded with gamma * x + beta
# ----------------------------------------------------------------------------
def _adain_kernel(x_ref, gb_ref, o_ref, *, eps, apply_norm, inv_hw):
    # x_ref  : (1, C_TILE, HW)   current (batch, channel-tile) slab
    # gb_ref : (1, C_TILE, 2)    per-sample [gamma | beta] columns
    # o_ref  : (1, C_TILE, HW)
    xf = x_ref[0].astype(jnp.float32)                     # (C_TILE, HW)
    gb = gb_ref[0].astype(jnp.float32)                    # (C_TILE, 2)
    gamma = gb[:, 0:1]                                    # (C_TILE, 1)
    beta = gb[:, 1:2]                                     # (C_TILE, 1)

    if apply_norm:
        # One-pass statistics over the lane (HW) axis.
        s1 = jnp.sum(xf, axis=1, keepdims=True)           # (C_TILE, 1)
        s2 = jnp.sum(xf * xf, axis=1, keepdims=True)      # (C_TILE, 1)
        mean = s1 * inv_hw
        var = jnp.maximum(s2 * inv_hw - mean * mean, 0.0)  # biased var, >= 0
        # Fold normalize + affine into one per-channel scale/shift.
        scale = gamma * lax.rsqrt(var + eps)               # (C_TILE, 1)
        shift = beta - mean * scale                        # (C_TILE, 1)
    else:
        scale = gamma
        shift = beta

    # Single elementwise sweep: 1 mul + 1 add per element.
    o_ref[0] = (xf * scale + shift).astype(o_ref.dtype)


def _pick_c_tile(C, HW, target_bytes=2 << 20):
    """Largest channel tile (divisor of C; multiple of 8 when < C) whose fp32
    working set C_TILE * HW * 4 stays under `target_bytes`."""
    if C * HW * 4 <= target_bytes:
        return C
    cap = max(8, (target_bytes // (HW * 4)) // 8 * 8)
    for cand in range(min(cap, C), 7, -8):
        if C % cand == 0:
            return cand
    # TODO(synk): if C has no multiple-of-8 divisor under the cap, fall back to
    # the full channel axis (may need a raised vmem_limit_bytes for huge C*HW).
    return C


# ----------------------------------------------------------------------------
# Forward wrapper
# ----------------------------------------------------------------------------
def adaptive_instance_norm(x_nchw, style, weight, bias, *, eps=1e-3):
    """Forward of AdaptiveInstanceNorm.

    x_nchw: (N, C, H, W), style: (N, style_dim)
    weight: (2C, style_dim), bias: (2C,)
    """
    N, C, H, W = x_nchw.shape
    HW = H * W

    # Tiny style projection: plain JAX (a dedicated Pallas matmul at
    # N x style_dim x 2C is pure launch/DMA overhead for an idle MXU).
    st = (style.astype(jnp.float32) @ weight.astype(jnp.float32).T
          + bias.astype(jnp.float32))                      # (N, 2C)
    # Pack gamma/beta per channel: (N, C, 2) with lane 0 = gamma, lane 1 = beta.
    gb = jnp.stack([st[:, :C], st[:, C:]], axis=-1)        # (N, C, 2)

    # Matches `if input.shape[3] > 1` (static shape check in PyTorch too).
    apply_norm = W > 1

    x_flat = x_nchw.reshape(N, C, HW)                      # free glue reshape
    c_tile = _pick_c_tile(C, HW)
    grid = (N, C // c_tile)

    # Note: for very large H*W (high-res StyleGAN) one would additionally split
    # HW across an 'arbitrary' grid axis with scratch s1/s2 accumulation; the
    # channel tiling above already bounds VMEM for typical generator sizes.
    out_flat = pl.pallas_call(
        functools.partial(_adain_kernel, eps=eps, apply_norm=apply_norm,
                          inv_hw=1.0 / HW),
        out_shape=jax.ShapeDtypeStruct((N, C, HW), x_nchw.dtype),
        grid=grid,
        in_specs=[
            pl.BlockSpec((1, c_tile, HW), lambda b, c: (b, c, 0)),
            pl.BlockSpec((1, c_tile, 2), lambda b, c: (b, c, 0)),
        ],
        out_specs=pl.BlockSpec((1, c_tile, HW), lambda b, c: (b, c, 0)),
        compiler_params=pltpu.CompilerParams(
            dimension_semantics=("parallel", "parallel")),
    )(x_flat, gb)

    return out_flat.reshape(N, C, H, W)


# ----------------------------------------------------------------------------
# Pure-JAX reference (mirrors the PyTorch module semantics)
# ----------------------------------------------------------------------------
def adain_reference(x, style, weight, bias, *, eps=1e-3):
    s = style @ weight.T + bias                            # (N, 2C)
    N, C = x.shape[0], x.shape[1]
    gamma = s[:, :C].reshape(N, C, 1, 1)
    beta = s[:, C:].reshape(N, C, 1, 1)
    out = x
    if x.shape[3] > 1:
        mean = jnp.mean(x, axis=(2, 3), keepdims=True)
        var = jnp.mean(jnp.square(x - mean), axis=(2, 3), keepdims=True)
        out = (x - mean) * lax.rsqrt(var + eps)
    return gamma * out + beta


if __name__ == "__main__":
    key = jax.random.PRNGKey(0)
    k_x, k_s, k_w = jax.random.split(key, 3)

    N, C, H, W = 2, 4, 16, 16
    style_dim = 32

    x = jax.random.normal(k_x, (N, C, H, W), dtype=jnp.float32)
    style = jax.random.normal(k_s, (N, style_dim), dtype=jnp.float32)

    # nn.Linear(style_dim, 2C) init: U(-1/sqrt(in), 1/sqrt(in)); bias zeroed,
    # then bias[:C] = 1, bias[C:] = 0 (per AdaptiveInstanceNorm.__init__).
    bound = 1.0 / jnp.sqrt(jnp.float32(style_dim))
    weight = jax.random.uniform(
        k_w, (2 * C, style_dim), minval=-bound, maxval=bound, dtype=jnp.float32
    )
    bias = jnp.concatenate(
        [jnp.ones((C,), jnp.float32), jnp.zeros((C,), jnp.float32)])

    out = adaptive_instance_norm(x, style, weight, bias)
    out = jax.block_until_ready(out)

    ref = adain_reference(x, style, weight, bias)
    assert out.shape == (N, C, H, W)
    assert jnp.allclose(out, ref, atol=1e-4, rtol=1e-4), "mismatch vs reference"

    print("KERNEL_OK")
</pallas_src>

<mosaic_0001>
module attributes {stable_mosaic.version = 11 : i64} {
  func.func @_adain_kernel(%arg0: i32, %arg1: i32, %arg2: memref<1x4x256xf32, #tpu.memory_space<vmem>>, %arg3: memref<1x4x2xf32, #tpu.memory_space<vmem>>, %arg4: memref<1x4x256xf32, #tpu.memory_space<vmem>>) attributes {dimension_semantics = [#tpu.dimension_semantics<parallel>, #tpu.dimension_semantics<parallel>], iteration_bounds = array<i64: 2, 1>, scalar_prefetch = 0 : i64, scratch_operands = 0 : i64, tpu.core_type = #tpu.core_type<tc>, window_params = [{transform_indices = @transform_0, window_bounds = array<i64: 1, 4, 256>}, {transform_indices = @transform_1, window_bounds = array<i64: 1, 4, 2>}, {transform_indices = @transform_2, window_bounds = array<i64: 1, 4, 256>}]} {
    %c0 = arith.constant 0 : index
    %c0_0 = arith.constant 0 : index
    %c0_1 = arith.constant 0 : index
    %0 = vector.load %arg2[%c0, %c0_0, %c0_1] : memref<1x4x256xf32, #tpu.memory_space<vmem>>, vector<1x4x256xf32>
    %1 = vector.shape_cast %0 : vector<1x4x256xf32> to vector<4x256xf32>
    %c0_2 = arith.constant 0 : index
    %c0_3 = arith.constant 0 : index
    %c0_4 = arith.constant 0 : index
    %2 = vector.load %arg3[%c0_2, %c0_3, %c0_4] : memref<1x4x2xf32, #tpu.memory_space<vmem>>, vector<1x4x2xf32>
    %3 = vector.shape_cast %2 : vector<1x4x2xf32> to vector<4x2xf32>
    %4 = vector.extract_strided_slice %3 {offsets = [0, 0], sizes = [4, 1], strides = [1, 1]} : vector<4x2xf32> to vector<4x1xf32>
    %5 = vector.extract_strided_slice %3 {offsets = [0, 1], sizes = [4, 1], strides = [1, 1]} : vector<4x2xf32> to vector<4x1xf32>
    %cst = arith.constant dense<0.000000e+00> : vector<4xf32>
    %6 = vector.multi_reduction <add>, %1, %cst [1] : vector<4x256xf32> to vector<4xf32>
    %7 = vector.shape_cast %6 : vector<4xf32> to vector<4x1xf32>
    %8 = arith.mulf %1, %1 : vector<4x256xf32>
    %cst_5 = arith.constant dense<0.000000e+00> : vector<4xf32>
    %9 = vector.multi_reduction <add>, %8, %cst_5 [1] : vector<4x256xf32> to vector<4xf32>
    %10 = vector.shape_cast %9 : vector<4xf32> to vector<4x1xf32>
    %cst_6 = arith.constant 3.906250e-03 : f32
    %11 = vector.broadcast %cst_6 : f32 to vector<4x1xf32>
    %12 = arith.mulf %7, %11 : vector<4x1xf32>
    %cst_7 = arith.constant 3.906250e-03 : f32
    %13 = vector.broadcast %cst_7 : f32 to vector<4x1xf32>
    %14 = arith.mulf %10, %13 : vector<4x1xf32>
    %15 = arith.mulf %12, %12 : vector<4x1xf32>
    %16 = arith.subf %14, %15 : vector<4x1xf32>
    %cst_8 = arith.constant 0.000000e+00 : f32
    %17 = vector.broadcast %cst_8 : f32 to vector<4x1xf32>
    %18 = arith.maximumf %16, %17 : vector<4x1xf32>
    %cst_9 = arith.constant 1.000000e-03 : f32
    %19 = vector.broadcast %cst_9 : f32 to vector<4x1xf32>
    %20 = arith.addf %18, %19 : vector<4x1xf32>
    %21 = math.rsqrt %20 : vector<4x1xf32>
    %22 = arith.mulf %4, %21 : vector<4x1xf32>
    %23 = arith.mulf %12, %22 : vector<4x1xf32>
    %24 = arith.subf %5, %23 : vector<4x1xf32>
    %25 = vector.broadcast %22 : vector<4x1xf32> to vector<4x256xf32>
    %26 = arith.mulf %1, %25 : vector<4x256xf32>
    %27 = vector.broadcast %24 : vector<4x1xf32> to vector<4x256xf32>
    %28 = arith.addf %26, %27 : vector<4x256xf32>
    %c0_10 = arith.constant 0 : index
    %c0_11 = arith.constant 0 : index
    %c0_12 = arith.constant 0 : index
    %29 = vector.load %arg4[%c0_10, %c0_11, %c0_12] : memref<1x4x256xf32, #tpu.memory_space<vmem>>, vector<1x4x256xf32>
    %30 = vector.shape_cast %29 : vector<1x4x256xf32> to vector<4x256xf32>
    %31 = vector.shape_cast %28 : vector<4x256xf32> to vector<1x4x256xf32>
    tpu.vector_store %arg4[%c0_10, %c0_11, %c0_12], %31 {strides = array<i32>} : memref<1x4x256xf32, #tpu.memory_space<vmem>>, vector<1x4x256xf32>,
    return
  }
  func.func @transform_0(%arg0: i32, %arg1: i32) -> (i32, i32, i32) {
    %c0_i32 = arith.constant 0 : i32
    %c0_i32_0 = arith.constant 0 : i32
    return %arg0, %arg1, %c0_i32 : i32, i32, i32
  }
  func.func @transform_1(%arg0: i32, %arg1: i32) -> (i32, i32, i32) {
    %c0_i32 = arith.constant 0 : i32
    %c0_i32_0 = arith.constant 0 : i32
    return %arg0, %arg1, %c0_i32 : i32, i32, i32
  }
  func.func @transform_2(%arg0: i32, %arg1: i32) -> (i32, i32, i32) {
    %c0_i32 = arith.constant 0 : i32
    %c0_i32_0 = arith.constant 0 : i32
    return %arg0, %arg1, %c0_i32 : i32, i32, i32
  }
}

</mosaic_0001>

<bundles_post_ra>
// kernel: tpu_custom_call.1
= control target key start
LH: loop header
LB: loop body
LE: loop exit
PB: predicated region body
PF: predicated region fallthrough
CT: control target
= control target key end

     0   :  { %7 = vsyncpa [#allocation3], 0  ;;  %s746_s0 = inlined_call_operand.hbm [shape: f32[2,4,256], index: 0, kind: input, shape index: {}]   ;;  %s747_s1 = inlined_call_operand.vmem [shape: f32[2,4,2], index: 1, kind: input, shape index: {}]   ;;  %s748_s2 = inlined_call_operand.hbm [shape: f32[2,4,256], index: 2, kind: output, shape index: {}]  }
   0x1   :  { %9 = vsyncpa [#allocation3 + $0x1], 0 }
   0x2   :  { %10 = vsyncpa [#allocation4], 0 }
   0x3   :  { %12 = vsyncpa [#allocation4 + $0x1], 0  ;;  %s603_s9 = smov 0   ;;  %s605_s10 = smov 0  }
   0x4   :  { %s607_s11 = smov 0   ;;  %s609_s12 = smov 0  }
   0x5   :  { %s611_s13 = smov 0   ;;  %s613_s14 = smov 0  }
   0x6 LB: > { %s383_s15 = sadd.s32 4294967295, %s580_s14   ;;  %s384_s16 = sadd.s32 4294967294, %s580_s14   ;;  %s580_s14 = sphi %s613_s14, %s18_s14   ;;  %s576_s13 = sphi %s611_s13, %s760_s13   ;;  %s572_s12 = sphi %s609_s12, %s759_s12   ;;  %s568_s11 = sphi %s607_s11, %s758_s11   ;;  %s564_s10 = sphi %s605_s10, %s757_s10   ;;  %s560_s9 = sphi %s603_s9, %s756_s9  }
   0x7   : > { %s30_s17 = sadd.s32 1, %s576_s13  ;;  %s39_s18 = sadd.s32 1, %s568_s11 }
   0x8   : > { %p32_p0 = scmp.ge.s32.totalorder %s30_s17, 2  ;;  %p46_p1 = scmp.ne.s32.totalorder %s568_s11, %s564_s10 }
   0x9   : > { %p47_p2 = scmp.eq.s32.totalorder %s580_s14, 0  ;;  %p52_p3 = scmp.ne.s32.totalorder %s564_s10, %s560_s9 }
   0xa   : > { %s762_s17 = smov (%p32_p0, %s30_s17), 0  ;;  %p53_p5 = scmp.eq.s32.totalorder %s383_s15, 0 }
   0xb   : > { %p644_p4 = por %p47_p2, %p46_p1  ;;  %s34_s20 = ssub.s32 %s576_s13, %s762_s17 }
   0xc   : > { %p106_p6 = scmp.eq.s32.totalorder %s383_s15, 1  ;;  %p37_p7 = scmp.eq.s32.totalorder %s34_s20, 0 }
   0xd   : > { %p650_p8 = por %p53_p5, %p52_p3  ;;  %p112_p10 = scmp.eq.s32.totalorder %s384_s16, 1 }
   0xe   : > { %p654_p9 = por %p106_p6, %p46_p1  ;;  %p413_p13 = scmp.lt.s32.totalorder %s580_s14, 2 }
   0xf   : > { %s659_s23 = scalar_select %p37_p7, %s568_s11, %s39_s18  }
  0x10   : > { %p661_p11 = por %p112_p10, %p52_p3  ;;  %s132_s25 = sand.u32 1, %s568_s11  }
  0x11   : > { %s387_s26 = sshll.u32 %s132_s25, 3  ;;  %s399_s27 = sshll.u32 %s576_s13, 7 }
  0x12   : > { %s752_s24 = scalar_select %p661_p11, 1, 0 }
  0x13   : > { %s144_s30 = scalar_lea.hbm %s746_s0, %s399_s27  ;;  %s136_s3 = scalar_lea.vmem [#allocation2], %s387_s26 }
  0x14   : > { %s146_s4 = sshll.u32 %s136_s3, 4  ;;  %p674_p0 = pnand %p413_p13, %p644_p4  ;;  %s147_s4 = int_to_ptr.vmem [resolvable:$true] %s146_s4 }
  0x15   : > { %p390_p1 = scmp.ge.s32.totalorder %s580_s14, 1  ;;  %p161_p2 = scmp.lt.s32.totalorder %s580_s14, 3 }
  0x16   : > { %s133_s6 = scalar_lea.sflag [#allocation3], %s132_s25  ;;  %p474_p3 = pneg %p674_p0 }
  0x17   : > { %s485_s7 = scalar_lea.vmem %s147_s4, 128  ;;  %s582_s8 = smov [#allocation2]  }
  0x18   : > { %p486_p5 = scmp.ne.s32.totalorder %s147_s4, %s485_s7  ;;  %s490_s15 = sshll.u32 %s582_s8, 4  ;;  %s491_s15 = int_to_ptr.vmem [resolvable:$false] %s490_s15 }
  0x19   : > { %s492_s16 = scalar_lea.vmem %s491_s15, 256  ;;  %p493_p10 = scmp.lt.s32.totalorder %s147_s4, %s491_s15 }
  0x1a   : > { %p488_p6 = pnand %p486_p5, %p474_p3  ;;  %p494_p12 = scmp.lt.s32.totalorder %s492_s16, %s485_s7 }
  0x1c   : > { %p489_p7 = pneg %p488_p6  ;;  %p495_p4 = por %p494_p12, %p493_p10 }
  0x1e   : > { %p496_p13 = pnand %p495_p4, %p489_p7 }
  0x20   : > { %499 = shalt.err (!%p496_p13)
}
  0x21   : > { %408 = dma.hbm_to_vmem [thread:$0]  (!%p674_p0), %s144_s30, 128, %s147_s4, %s133_s6  }
  0x22   : > { %p162_p11 = pnand %p390_p1, %p161_p2 }
  0x23   : > { %s689_s18 = sand.u32 (!%p162_p11), 1, %s564_s10  }
  0x24   : > { %165 = sbr.rel (%p162_p11) target bundleno = 474 (0x1da), region = 28  ;;  %s391_s19 = sshll.u32 (!%p162_p11), %s689_s18, 3 }
  0x25   : > { %s168_s20 = scalar_lea.sflag (!%p162_p11), [#allocation3], %s689_s18  ;;  %s171_s25 = scalar_lea.vmem (!%p162_p11), [#allocation2], %s391_s19 }
  0x29   : > { %551 = dma.done.wait (%p650_p8), %s168_s20, 128  }
  0x2a   : > { %553 = vsyncadd (%p650_p8), %s168_s20, 4294967168  ;;  %vm211_vm0 = vcmask 1043456   ;;  %v206_v0 = vld [vmem:[%s171_s25] sm:$0xff]  ;;  %v583_v10 = vmov 0   ;;  %p199_p8 = scmp.lt.s32.totalorder %s572_s12, 1  ;;  %v584_v19 = vmov 1   ;;  %v247_v28 = vlaneseq }
  0x2b   : > { %v209_v1 = vcombine.high %v206_v0, %v206_v0  ;;  %v212_v2 = vsel %vm211_vm0, %v206_v0, 0.0  ;;  %v217_v3 = vmul.f32 %v206_v0, %v206_v0  ;;  %467 = vset.pattern.permute.xlu1 %v583_v10  ;;  %468 = vset.pattern.permute.xlu0 %v584_v19  ;;  %s585_s30 = smov 1   ;;  %v586_v26 = vmov 839922192   ;;  %s400_s3 = sshll.u32 %s572_s12, 7 }
  0x2c   : > { %s200_s21 = scalar_select %p199_p8, %s572_s12, 1  ;;  %v245_v27 = vunpack.c.l.s4 %v586_v26  ;;  %v248_v30 = vshrl.u32 %v247_v28, 7 }
  0x2d   : > { %v213_v4 = vsel %vm211_vm0, %v209_v1, 0.0  ;;  %v219_v5 = vcombine.high %v217_v3, %v217_v3  ;;  %v221_v6 = vsel %vm211_vm0, %v217_v3, 0.0  ;;  %s198_s4 = scalar_lea.vmem [#allocation5], %s391_s19  ;;  %s282_s8 = scalar_lea.hbm %s748_s2, %s400_s3 }
  0x2e   : > { %v214_v7 = vadd.f32 %v213_v4, %v212_v2  ;;  %s393_s26 = sshll.u32 %s200_s21, 2  ;;  %v246_v29 = vunpack.c.0.s8 %v245_v27  ;;  %s284_s5 = sshll.u32 %s198_s4, 4  ;;  %s285_s5 = int_to_ptr.vmem [resolvable:$true] %s284_s5 }
  0x2f   : > { %v222_v8 = vsel %vm211_vm0, %v219_v5, 0.0  ;;  %s205_s29 = scalar_lea.vmem %s747_s1, %s393_s26  ;;  %s268_s15 = scalar_lea.sflag [#allocation4], %s689_s18 }
  0x30   : > { %215 = vadd.xlane.f32.xlu0 %v214_v7  ;;  %v223_v9 = vadd.f32 %v222_v8, %v221_v6  ;;  %v207_v20 = vld [vmem:[%s205_s29] sm:$0xf]  ;;  %v249_v31 = vsub.s32 %v246_v29, %v248_v30  ;;  %s500_s16 = scalar_lea.vmem %s285_s5, 128  ;;  %s587_s20 = smov [#allocation5]  }
  0x31   : > { %p501_p11 = scmp.ne.s32.totalorder %s285_s5, %s500_s16  ;;  %s504_s12 = sshll.u32 %s587_s20, 4  ;;  %s505_s12 = int_to_ptr.vmem [resolvable:$false] %s504_s12 }
  0x32   : > { %s506_s19 = scalar_lea.vmem %s505_s12, 256  ;;  %p507_p1 = scmp.lt.s32.totalorder %s285_s5, %s505_s12 }
  0x33   : > { %p502_p12 = pnand %p501_p11, %p654_p9  ;;  %p508_p2 = scmp.lt.s32.totalorder %s506_s19, %s500_s16 }
  0x34   : > { %224 = vadd.xlane.f32.xlu0 %v223_v9 }
  0x35   : > { %p503_p0 = pneg %p502_p12  ;;  %p509_p3 = por %p508_p2, %p507_p1 }
  0x37   : > { %p510_p5 = pnand %p509_p3, %p503_p0 }
  0xb9   : > { %v216_v11 = vpop.xlane.xlu0 %215 }
  0xba   : > { %v226_v12 = vmul.f32 0.00390625, %v216_v11 }
  0xbc   : > { %v228_v14 = vmul.f32 %v226_v12, %v226_v12 }
  0xbd   : > { %v225_v13 = vpop.xlane.xlu0 %224 }
  0xbe   : > { %v227_v15 = vmul.f32 0.00390625, %v225_v13 }
  0xc0   : > { %v229_v16 = vsub.f32 %v227_v15, %v228_v14 }
  0xc2   : > { %v230_v17 = vmax.f32 %v229_v16, 0.0 }
  0xc4   : > { %v231_v18 = vadd.f32 0.001, %v230_v17 }
  0xc6   : > { %470 = vrsqrt.f32 %v231_v18 }
  0xd3   : > { %v471_v21 = vpop.eup %470 }
  0xd4   : > { %v233_v22 = vmul.f32 %v471_v21, %v207_v20 }
  0xd6   : > { %v234_v23 = vmul.f32 %v233_v22, %v226_v12 }
  0xd8   : > { %236 = vrot.lane.b32.xlu1 %v234_v23, %s585_s30 }
  0xdc   : > { %242 = vperm.xlu1 %467, %v233_v22  }
 0x14a   : > { %v237_v24 = vpop.permute.xlu1 %236 }
 0x14b   : > { %v239_v25 = vsub.f32 %v207_v20, %v237_v24 }
 0x14d   : > { %255 = vperm.xlu0 %468, %v239_v25  }
 0x157   : > { %v243_v32 = vpop.permute.xlu1 %242 }
 0x158   : > { %v250_v33 = vrot.slane %v243_v32, %v249_v31 }
 0x15a   : > { %v252_v35 = vmul.f32 %v250_v33, %v206_v0 }
 0x1c8   : > { %v256_v34 = vpop.permute.xlu0 %255 }
 0x1c9   : > { %v263_v36 = vrot.slane %v256_v34, %v249_v31 }
 0x1cb   : > { %v265_v37 = vadd.f32 %v263_v36, %v252_v35 }
 0x1cd   : > { %266 = vst [vmem:[%s198_s4] sm:$0xff] %v265_v37 }
 0x1ce   : > { %513 = shalt.err (!%p510_p5)
}
 0x1cf   : > { %s514_s25 = scalar_lea.hbm %s282_s8, 128  ;;  %s518_s26 = scalar_lea.hbm %s748_s2, 256 }
 0x1d0   : > { %p515_p6 = scmp.ne.s32.totalorder %s282_s8, %s514_s25  ;;  %p519_p4 = scmp.lt.s32.totalorder %s282_s8, %s748_s2 }
 0x1d1   : > { %p520_p13 = scmp.lt.s32.totalorder %s518_s26, %s514_s25 }
 0x1d2   : > { %p516_p7 = pnand %p515_p6, %p654_p9 }
 0x1d3   : > { %p521_p8 = por %p520_p13, %p519_p4 }
 0x1d4   : > { %p517_p10 = pneg %p516_p7 }
 0x1d6   : > { %p522_p11 = pnand %p521_p8, %p517_p10 }
 0x1d8   : > { %525 = shalt.err (!%p522_p11)
}
 0x1d9   : > { %403 = dma.vmem_to_hbm [thread:$0]  (%p654_p9), %s285_s5, 128, %s282_s8, %s268_s15  }
 0x1da PF: > { %s296_s29 = sand.u32 1, %s560_s9   ;;  %p754_p12 = scmp.ne.s32.totalorder %s752_s24, 0 }
 0x1db   : > { %p755_p0 = scmp.ge.s32.totalorder %s580_s14, 2  ;;  %s297_s30 = scalar_lea.sflag [#allocation4], %s296_s29 }
 0x1dd   : > { %p410_p1 = pnand %p755_p0, %p754_p12 }
 0x1df   : > { %p411_p2 = pneg %p410_p1 }
 0x1e1   : > { %555 = dma.done.wait (%p411_p2), %s297_s30, 128  }
 0x1e2   : > { %557 = vsyncadd (%p411_p2), %s297_s30, 4294967168  ;;  %s18_s14 = sadd.s32 1, %s580_s14   ;;  %s756_s9 = smov %s564_s10 }
 0x1e3   : > { %p15_p3 = scmp.ge.s32.totalorder %s18_s14, 4   ;;  %s757_s10 = smov %s568_s11 }
 0x1e4   : > { %s758_s11 = smov %s659_s23  ;;  %s759_s12 = smov %s576_s13 }
 0x1e5   : > { %s760_s13 = smov %s762_s17  ;;  %17 = sbr.rel (!%p15_p3) target bundleno = 6 (0x6), region = 76 }
 0x1ea   :  { %302 = vsyncpa [#allocation3], 1 }
 0x1eb   :  { %304 = vsyncpa [#allocation3 + $0x1], 1 }
 0x1ec   :  { %305 = vsyncpa [#allocation4], 1 }
 0x1ed   :  { %307 = vsyncpa [#allocation4 + $0x1], 1 }

</bundles_post_ra>
